<compile_context>
chip_gen: v6e
topology: v6e:2x2x1
jax: 0.10.0
libtpu: 0.0.40
codegen_flags: <defaults>
</compile_context>

<pallas_src>
import functools

import jax
import jax.numpy as jnp
import numpy as np
from jax import lax
from jax.experimental import pallas as pl
from jax.experimental.pallas import tpu as pltpu


def _fused_mbconv_kernel(x_ref, w1_ref, b1_ref, w2_ref, b2_ref, o_ref,
                         patches_ref, *, NB, L, Wp, K):
    """One batch-block (NB images) per grid step, channel-major compute.

    x_ref      : (NB, Cin, Lflat)   zero-padded input, spatially flattened
                                    (Lflat >= (K-1)*(Wp+1) + H*Wp)
    w1_ref     : (Cmid, K*K*Cin)    spatial conv weight, BN1 scale folded in
    b1_ref     : (Cmid, 1)          folded BN1 bias
    w2_ref     : (Cout, Cmid)       pointwise conv weight, BN2 scale folded in
    b2_ref     : (Cout, 1)          folded BN2 bias
    o_ref      : (NB, Cout, L)      output on the padded-width grid (L = H*Wp)
    patches_ref: (K*K*Cin, NB*L)    VMEM scratch: im2col slab for the block
    """
    cin = x_ref.shape[1]

    # --- im2col: each tap (kh, kw) of each image is a contiguous lane window
    # of the flat padded input, stacked along sublanes (taps) and lanes
    # (batch-block).  No reshapes / relayouts.
    for nb in range(NB):
        xb = x_ref[nb]  # (Cin, Lflat), lanes = flattened spatial axis
        for kh in range(K):
            for kw in range(K):
                t = kh * K + kw
                s = kh * Wp + kw
                patches_ref[t * cin:(t + 1) * cin,
                            nb * L:(nb + 1) * L] = xb[:, s:s + L]

    # --- spatial KxK conv as ONE MXU matmul: (Cmid, K*K*Cin) @ (K*K*Cin, NB*L)
    mid = jnp.dot(w1_ref[...], patches_ref[...],
                  preferred_element_type=jnp.float32)
    # BN1 bias (scale already folded into w1) + ReLU6.
    mid = mid + b1_ref[...]
    mid = jnp.minimum(jnp.maximum(mid, 0.0), 6.0)

    # --- pointwise 1x1 conv + BN2 bias (scale folded into w2), no activation.
    out = jnp.dot(w2_ref[...], mid, preferred_element_type=jnp.float32)
    out = out + b2_ref[...]

    # --- scatter the batch-block back out (per-image lane windows).
    for nb in range(NB):
        o_ref[nb] = out[:, nb * L:(nb + 1) * L].astype(o_ref.dtype)


def _fold_bn(gamma, beta, mean, var, eps=1e-5):
    scale = gamma / jnp.sqrt(var + eps)
    bias = beta - mean * scale
    return scale, bias


def fused_mbconv(x_nchw, w1_oihw, bn1, w2_oihw, bn2, *, kernel_size=3,
                 eps=1e-5, batch_block=None):
    """FusedMBConv forward.

    x_nchw : (N, Cin, H, W) float32 (PyTorch NCHW layout)
    w1_oihw: (Cmid, Cin, K, K)      spatial conv weight (PyTorch OIHW)
    bn1    : (gamma, beta, running_mean, running_var), each (Cmid,)
    w2_oihw: (Cout, Cmid, 1, 1)     pointwise conv weight
    bn2    : (gamma, beta, running_mean, running_var), each (Cout,)
    Returns (N, Cout, H, W) float32 (NCHW).
    """
    N, Cin, H, W = x_nchw.shape
    K = kernel_size
    pad = K // 2  # get_same_padding(K) for odd K, stride 1
    Cmid = w1_oihw.shape[0]
    Cout = w2_oihw.shape[0]

    # Fold inference-mode BN into per-channel scale/bias; fold the scales
    # directly into the conv weights (wrapper-side weight prep only).
    s1, b1 = _fold_bn(*bn1, eps=eps)
    s2, b2 = _fold_bn(*bn2, eps=eps)
    # w1f[cm, (kh*K + kw)*Cin + c] = w1[cm, c, kh, kw] * s1[cm]
    w1f = (w1_oihw.transpose(0, 2, 3, 1).reshape(Cmid, K * K * Cin)
           * s1[:, None]).astype(jnp.float32)
    w2f = (w2_oihw[:, :, 0, 0] * s2[:, None]).astype(jnp.float32)
    b1c = b1.reshape(Cmid, 1).astype(jnp.float32)
    b2c = b2.reshape(Cout, 1).astype(jnp.float32)

    # Spatial zero-pad + flatten (free row-major reshape in HBM).  Pad the flat
    # axis so the last tap's lane window stays in bounds.
    Hp, Wp = H + 2 * pad, W + 2 * pad
    L = H * Wp
    Lneed = (K - 1) * Wp + (K - 1) + L
    Lflat = max(Hp * Wp, Lneed)

    # Batch-block size: whole batch when small (bounded so the im2col slab and
    # double-buffered I/O blocks stay well inside VMEM).
    if batch_block is None:
        NB = max(1, min(N, 32))
    else:
        NB = max(1, min(N, batch_block))
    n_steps = (N + NB - 1) // NB
    Npad = n_steps * NB

    x_pad = jnp.pad(x_nchw, ((0, Npad - N), (0, 0), (pad, pad), (pad, pad)))
    x_flat = x_pad.reshape(Npad, Cin, Hp * Wp)
    if Lflat > Hp * Wp:
        x_flat = jnp.pad(x_flat, ((0, 0), (0, 0), (0, Lflat - Hp * Wp)))

    kernel = functools.partial(_fused_mbconv_kernel, NB=NB, L=L, Wp=Wp, K=K)

    out_flat = pl.pallas_call(
        kernel,
        out_shape=jax.ShapeDtypeStruct((Npad, Cout, L), jnp.float32),
        grid_spec=pltpu.PrefetchScalarGridSpec(
            num_scalar_prefetch=0,
            grid=(n_steps,),
            in_specs=[
                pl.BlockSpec((NB, Cin, Lflat), lambda n: (n, 0, 0)),
                pl.BlockSpec((Cmid, K * K * Cin), lambda n: (0, 0)),
                pl.BlockSpec((Cmid, 1), lambda n: (0, 0)),
                pl.BlockSpec((Cout, Cmid), lambda n: (0, 0)),
                pl.BlockSpec((Cout, 1), lambda n: (0, 0)),
            ],
            out_specs=pl.BlockSpec((NB, Cout, L), lambda n: (n, 0, 0)),
            scratch_shapes=[pltpu.VMEM((K * K * Cin, NB * L), jnp.float32)],
        ),
        compiler_params=pltpu.CompilerParams(
            dimension_semantics=("parallel",)),
    )(x_flat, w1f, b1c, w2f, b2c)

    # Drop the padded-width columns and any batch padding:
    # (Npad, Cout, H, Wp) -> (N, Cout, H, W).
    return out_flat.reshape(Npad, Cout, H, Wp)[:N, :, :, :W]


def _reference(x_nchw, w1_oihw, bn1, w2_oihw, bn2, eps=1e-5):
    """Pure-JAX reference (same math) for the correctness check."""
    s1, b1 = _fold_bn(*bn1, eps=eps)
    s2, b2 = _fold_bn(*bn2, eps=eps)
    y = lax.conv_general_dilated(
        x_nchw, w1_oihw, window_strides=(1, 1), padding="SAME",
        dimension_numbers=("NCHW", "OIHW", "NCHW"))
    y = y * s1[None, :, None, None] + b1[None, :, None, None]
    y = jnp.minimum(jnp.maximum(y, 0.0), 6.0)
    y = lax.conv_general_dilated(
        y, w2_oihw, window_strides=(1, 1), padding="VALID",
        dimension_numbers=("NCHW", "OIHW", "NCHW"))
    y = y * s2[None, :, None, None] + b2[None, :, None, None]
    return y


if __name__ == "__main__":
    # Module config (small): in_channels=4, out_channels=8, kernel_size=3,
    # stride=1, expand_ratio=6 -> mid_channels=24.
    N, Cin, H, W = 2, 4, 16, 16
    Cout = 8
    expand_ratio = 6
    Cmid = round(Cin * expand_ratio)  # 24
    K = 3

    key = jax.random.PRNGKey(0)
    keys = jax.random.split(key, 12)

    # Input in PyTorch NCHW layout (used directly, no transposes).
    x = jax.random.normal(keys[0], (N, Cin, H, W), dtype=jnp.float32)

    # spatial_conv: Conv2d(Cin, Cmid, 3, bias=False) weight in OIHW.
    w1 = jax.random.normal(keys[1], (Cmid, Cin, K, K), dtype=jnp.float32) * 0.1
    g1 = 0.5 + jax.random.uniform(keys[2], (Cmid,), dtype=jnp.float32)
    be1 = jax.random.normal(keys[3], (Cmid,), dtype=jnp.float32) * 0.1
    m1 = jax.random.normal(keys[4], (Cmid,), dtype=jnp.float32) * 0.1
    v1 = 0.5 + jax.random.uniform(keys[5], (Cmid,), dtype=jnp.float32)
    bn1 = (g1, be1, m1, v1)

    # point_conv: Conv2d(Cmid, Cout, 1, bias=False) weight in OIHW.
    w2 = jax.random.normal(keys[6], (Cout, Cmid, 1, 1), dtype=jnp.float32) * 0.1
    g2 = 0.5 + jax.random.uniform(keys[7], (Cout,), dtype=jnp.float32)
    be2 = jax.random.normal(keys[8], (Cout,), dtype=jnp.float32) * 0.1
    m2 = jax.random.normal(keys[9], (Cout,), dtype=jnp.float32) * 0.1
    v2 = 0.5 + jax.random.uniform(keys[10], (Cout,), dtype=jnp.float32)
    bn2 = (g2, be2, m2, v2)

    out = fused_mbconv(x, w1, bn1, w2, bn2, kernel_size=K)
    out = jax.block_until_ready(out)

    ref = _reference(x, w1, bn1, w2, bn2)
    np.testing.assert_allclose(np.asarray(out), np.asarray(ref),
                               rtol=1e-4, atol=1e-4)

    print("KERNEL_OK")
</pallas_src>

<mosaic_0001>
module attributes {stable_mosaic.version = 11 : i64} {
  func.func @_fused_mbconv_kernel(%arg0: i32, %arg1: memref<2x4x326xf32, #tpu.memory_space<vmem>>, %arg2: memref<24x36xf32, #tpu.memory_space<vmem>>, %arg3: memref<24x1xf32, #tpu.memory_space<vmem>>, %arg4: memref<8x24xf32, #tpu.memory_space<vmem>>, %arg5: memref<8x1xf32, #tpu.memory_space<vmem>>, %arg6: memref<2x8x288xf32, #tpu.memory_space<vmem>>, %arg7: memref<36x576xf32, #tpu.memory_space<vmem>>) attributes {dimension_semantics = [#tpu.dimension_semantics<parallel>], iteration_bounds = array<i64: 1>, scalar_prefetch = 0 : i64, scratch_operands = 1 : i64, tpu.core_type = #tpu.core_type<tc>, window_params = [{transform_indices = @transform_0, window_bounds = array<i64: 2, 4, 326>}, {pipeline_mode = #tpu.pipeline_mode<synchronous>, transform_indices = @transform_1, window_bounds = array<i64: 24, 36>}, {pipeline_mode = #tpu.pipeline_mode<synchronous>, transform_indices = @transform_2, window_bounds = array<i64: 24, 1>}, {pipeline_mode = #tpu.pipeline_mode<synchronous>, transform_indices = @transform_3, window_bounds = array<i64: 8, 24>}, {pipeline_mode = #tpu.pipeline_mode<synchronous>, transform_indices = @transform_4, window_bounds = array<i64: 8, 1>}, {transform_indices = @transform_5, window_bounds = array<i64: 2, 8, 288>}]} {
    %c0 = arith.constant 0 : index
    %c0_0 = arith.constant 0 : index
    %c0_1 = arith.constant 0 : index
    %0 = vector.load %arg1[%c0, %c0_0, %c0_1] : memref<2x4x326xf32, #tpu.memory_space<vmem>>, vector<1x4x326xf32>
    %1 = vector.shape_cast %0 : vector<1x4x326xf32> to vector<4x326xf32>
    %2 = vector.extract_strided_slice %1 {offsets = [0, 0], sizes = [4, 288], strides = [1, 1]} : vector<4x326xf32> to vector<4x288xf32>
    %c0_2 = arith.constant 0 : index
    %c0_3 = arith.constant 0 : index
    %3 = vector.load %arg7[%c0_2, %c0_3] : memref<36x576xf32, #tpu.memory_space<vmem>>, vector<4x288xf32>
    tpu.vector_store %arg7[%c0_2, %c0_3], %2 {strides = array<i32>} : memref<36x576xf32, #tpu.memory_space<vmem>>, vector<4x288xf32>,
    %4 = vector.extract_strided_slice %1 {offsets = [0, 1], sizes = [4, 288], strides = [1, 1]} : vector<4x326xf32> to vector<4x288xf32>
    %c4 = arith.constant 4 : index
    %c0_4 = arith.constant 0 : index
    %5 = vector.load %arg7[%c4, %c0_4] : memref<36x576xf32, #tpu.memory_space<vmem>>, vector<4x288xf32>
    tpu.vector_store %arg7[%c4, %c0_4], %4 {strides = array<i32>} : memref<36x576xf32, #tpu.memory_space<vmem>>, vector<4x288xf32>,
    %6 = vector.extract_strided_slice %1 {offsets = [0, 2], sizes = [4, 288], strides = [1, 1]} : vector<4x326xf32> to vector<4x288xf32>
    %c8 = arith.constant 8 : index
    %c0_5 = arith.constant 0 : index
    %7 = vector.load %arg7[%c8, %c0_5] : memref<36x576xf32, #tpu.memory_space<vmem>>, vector<4x288xf32>
    tpu.vector_store %arg7[%c8, %c0_5], %6 {strides = array<i32>} : memref<36x576xf32, #tpu.memory_space<vmem>>, vector<4x288xf32>,
    %8 = vector.extract_strided_slice %1 {offsets = [0, 18], sizes = [4, 288], strides = [1, 1]} : vector<4x326xf32> to vector<4x288xf32>
    %c12 = arith.constant 12 : index
    %c0_6 = arith.constant 0 : index
    %9 = vector.load %arg7[%c12, %c0_6] : memref<36x576xf32, #tpu.memory_space<vmem>>, vector<4x288xf32>
    tpu.vector_store %arg7[%c12, %c0_6], %8 {strides = array<i32>} : memref<36x576xf32, #tpu.memory_space<vmem>>, vector<4x288xf32>,
    %10 = vector.extract_strided_slice %1 {offsets = [0, 19], sizes = [4, 288], strides = [1, 1]} : vector<4x326xf32> to vector<4x288xf32>
    %c16 = arith.constant 16 : index
    %c0_7 = arith.constant 0 : index
    %11 = vector.load %arg7[%c16, %c0_7] : memref<36x576xf32, #tpu.memory_space<vmem>>, vector<4x288xf32>
    tpu.vector_store %arg7[%c16, %c0_7], %10 {strides = array<i32>} : memref<36x576xf32, #tpu.memory_space<vmem>>, vector<4x288xf32>,
    %12 = vector.extract_strided_slice %1 {offsets = [0, 20], sizes = [4, 288], strides = [1, 1]} : vector<4x326xf32> to vector<4x288xf32>
    %c20 = arith.constant 20 : index
    %c0_8 = arith.constant 0 : index
    %13 = vector.load %arg7[%c20, %c0_8] : memref<36x576xf32, #tpu.memory_space<vmem>>, vector<4x288xf32>
    tpu.vector_store %arg7[%c20, %c0_8], %12 {strides = array<i32>} : memref<36x576xf32, #tpu.memory_space<vmem>>, vector<4x288xf32>,
    %14 = vector.extract_strided_slice %1 {offsets = [0, 36], sizes = [4, 288], strides = [1, 1]} : vector<4x326xf32> to vector<4x288xf32>
    %c24 = arith.constant 24 : index
    %c0_9 = arith.constant 0 : index
    %15 = vector.load %arg7[%c24, %c0_9] : memref<36x576xf32, #tpu.memory_space<vmem>>, vector<4x288xf32>
    tpu.vector_store %arg7[%c24, %c0_9], %14 {strides = array<i32>} : memref<36x576xf32, #tpu.memory_space<vmem>>, vector<4x288xf32>,
    %16 = vector.extract_strided_slice %1 {offsets = [0, 37], sizes = [4, 288], strides = [1, 1]} : vector<4x326xf32> to vector<4x288xf32>
    %c28 = arith.constant 28 : index
    %c0_10 = arith.constant 0 : index
    %17 = vector.load %arg7[%c28, %c0_10] : memref<36x576xf32, #tpu.memory_space<vmem>>, vector<4x288xf32>
    tpu.vector_store %arg7[%c28, %c0_10], %16 {strides = array<i32>} : memref<36x576xf32, #tpu.memory_space<vmem>>, vector<4x288xf32>,
    %18 = vector.extract_strided_slice %1 {offsets = [0, 38], sizes = [4, 288], strides = [1, 1]} : vector<4x326xf32> to vector<4x288xf32>
    %c32 = arith.constant 32 : index
    %c0_11 = arith.constant 0 : index
    %19 = vector.load %arg7[%c32, %c0_11] : memref<36x576xf32, #tpu.memory_space<vmem>>, vector<4x288xf32>
    tpu.vector_store %arg7[%c32, %c0_11], %18 {strides = array<i32>} : memref<36x576xf32, #tpu.memory_space<vmem>>, vector<4x288xf32>,
    %c1 = arith.constant 1 : index
    %c0_12 = arith.constant 0 : index
    %c0_13 = arith.constant 0 : index
    %20 = vector.load %arg1[%c1, %c0_12, %c0_13] : memref<2x4x326xf32, #tpu.memory_space<vmem>>, vector<1x4x326xf32>
    %21 = vector.shape_cast %20 : vector<1x4x326xf32> to vector<4x326xf32>
    %22 = vector.extract_strided_slice %21 {offsets = [0, 0], sizes = [4, 288], strides = [1, 1]} : vector<4x326xf32> to vector<4x288xf32>
    %c0_14 = arith.constant 0 : index
    %c288 = arith.constant 288 : index
    %23 = vector.load %arg7[%c0_14, %c288] : memref<36x576xf32, #tpu.memory_space<vmem>>, vector<4x288xf32>
    tpu.vector_store %arg7[%c0_14, %c288], %22 {strides = array<i32>} : memref<36x576xf32, #tpu.memory_space<vmem>>, vector<4x288xf32>,
    %24 = vector.extract_strided_slice %21 {offsets = [0, 1], sizes = [4, 288], strides = [1, 1]} : vector<4x326xf32> to vector<4x288xf32>
    %c4_15 = arith.constant 4 : index
    %c288_16 = arith.constant 288 : index
    %25 = vector.load %arg7[%c4_15, %c288_16] : memref<36x576xf32, #tpu.memory_space<vmem>>, vector<4x288xf32>
    tpu.vector_store %arg7[%c4_15, %c288_16], %24 {strides = array<i32>} : memref<36x576xf32, #tpu.memory_space<vmem>>, vector<4x288xf32>,
    %26 = vector.extract_strided_slice %21 {offsets = [0, 2], sizes = [4, 288], strides = [1, 1]} : vector<4x326xf32> to vector<4x288xf32>
    %c8_17 = arith.constant 8 : index
    %c288_18 = arith.constant 288 : index
    %27 = vector.load %arg7[%c8_17, %c288_18] : memref<36x576xf32, #tpu.memory_space<vmem>>, vector<4x288xf32>
    tpu.vector_store %arg7[%c8_17, %c288_18], %26 {strides = array<i32>} : memref<36x576xf32, #tpu.memory_space<vmem>>, vector<4x288xf32>,
    %28 = vector.extract_strided_slice %21 {offsets = [0, 18], sizes = [4, 288], strides = [1, 1]} : vector<4x326xf32> to vector<4x288xf32>
    %c12_19 = arith.constant 12 : index
    %c288_20 = arith.constant 288 : index
    %29 = vector.load %arg7[%c12_19, %c288_20] : memref<36x576xf32, #tpu.memory_space<vmem>>, vector<4x288xf32>
    tpu.vector_store %arg7[%c12_19, %c288_20], %28 {strides = array<i32>} : memref<36x576xf32, #tpu.memory_space<vmem>>, vector<4x288xf32>,
    %30 = vector.extract_strided_slice %21 {offsets = [0, 19], sizes = [4, 288], strides = [1, 1]} : vector<4x326xf32> to vector<4x288xf32>
    %c16_21 = arith.constant 16 : index
    %c288_22 = arith.constant 288 : index
    %31 = vector.load %arg7[%c16_21, %c288_22] : memref<36x576xf32, #tpu.memory_space<vmem>>, vector<4x288xf32>
    tpu.vector_store %arg7[%c16_21, %c288_22], %30 {strides = array<i32>} : memref<36x576xf32, #tpu.memory_space<vmem>>, vector<4x288xf32>,
    %32 = vector.extract_strided_slice %21 {offsets = [0, 20], sizes = [4, 288], strides = [1, 1]} : vector<4x326xf32> to vector<4x288xf32>
    %c20_23 = arith.constant 20 : index
    %c288_24 = arith.constant 288 : index
    %33 = vector.load %arg7[%c20_23, %c288_24] : memref<36x576xf32, #tpu.memory_space<vmem>>, vector<4x288xf32>
    tpu.vector_store %arg7[%c20_23, %c288_24], %32 {strides = array<i32>} : memref<36x576xf32, #tpu.memory_space<vmem>>, vector<4x288xf32>,
    %34 = vector.extract_strided_slice %21 {offsets = [0, 36], sizes = [4, 288], strides = [1, 1]} : vector<4x326xf32> to vector<4x288xf32>
    %c24_25 = arith.constant 24 : index
    %c288_26 = arith.constant 288 : index
    %35 = vector.load %arg7[%c24_25, %c288_26] : memref<36x576xf32, #tpu.memory_space<vmem>>, vector<4x288xf32>
    tpu.vector_store %arg7[%c24_25, %c288_26], %34 {strides = array<i32>} : memref<36x576xf32, #tpu.memory_space<vmem>>, vector<4x288xf32>,
    %36 = vector.extract_strided_slice %21 {offsets = [0, 37], sizes = [4, 288], strides = [1, 1]} : vector<4x326xf32> to vector<4x288xf32>
    %c28_27 = arith.constant 28 : index
    %c288_28 = arith.constant 288 : index
    %37 = vector.load %arg7[%c28_27, %c288_28] : memref<36x576xf32, #tpu.memory_space<vmem>>, vector<4x288xf32>
    tpu.vector_store %arg7[%c28_27, %c288_28], %36 {strides = array<i32>} : memref<36x576xf32, #tpu.memory_space<vmem>>, vector<4x288xf32>,
    %38 = vector.extract_strided_slice %21 {offsets = [0, 38], sizes = [4, 288], strides = [1, 1]} : vector<4x326xf32> to vector<4x288xf32>
    %c32_29 = arith.constant 32 : index
    %c288_30 = arith.constant 288 : index
    %39 = vector.load %arg7[%c32_29, %c288_30] : memref<36x576xf32, #tpu.memory_space<vmem>>, vector<4x288xf32>
    tpu.vector_store %arg7[%c32_29, %c288_30], %38 {strides = array<i32>} : memref<36x576xf32, #tpu.memory_space<vmem>>, vector<4x288xf32>,
    %c0_31 = arith.constant 0 : index
    %c0_32 = arith.constant 0 : index
    %40 = vector.load %arg2[%c0_31, %c0_32] : memref<24x36xf32, #tpu.memory_space<vmem>>, vector<24x36xf32>
    %c0_33 = arith.constant 0 : index
    %c0_34 = arith.constant 0 : index
    %41 = vector.load %arg7[%c0_33, %c0_34] : memref<36x576xf32, #tpu.memory_space<vmem>>, vector<36x576xf32>
    %cst = arith.constant dense<0.000000e+00> : vector<24x576xf32>
    %42 = tpu.matmul %40, %41, %cst {dimension_numbers = #tpu.dot_dimension_numbers<[1], [0], [0], [1], [0, 0, 1, 1], [], []>} : vector<24x36xf32>, vector<36x576xf32>, vector<24x576xf32> -> vector<24x576xf32>
    %c0_35 = arith.constant 0 : index
    %c0_36 = arith.constant 0 : index
    %43 = vector.load %arg3[%c0_35, %c0_36] : memref<24x1xf32, #tpu.memory_space<vmem>>, vector<24x1xf32>
    %44 = vector.broadcast %43 : vector<24x1xf32> to vector<24x576xf32>
    %45 = arith.addf %42, %44 : vector<24x576xf32>
    %cst_37 = arith.constant 0.000000e+00 : f32
    %46 = vector.broadcast %cst_37 : f32 to vector<24x576xf32>
    %47 = arith.maximumf %45, %46 : vector<24x576xf32>
    %cst_38 = arith.constant 6.000000e+00 : f32
    %48 = vector.broadcast %cst_38 : f32 to vector<24x576xf32>
    %49 = arith.minimumf %47, %48 : vector<24x576xf32>
    %c0_39 = arith.constant 0 : index
    %c0_40 = arith.constant 0 : index
    %50 = vector.load %arg4[%c0_39, %c0_40] : memref<8x24xf32, #tpu.memory_space<vmem>>, vector<8x24xf32>
    %cst_41 = arith.constant dense<0.000000e+00> : vector<8x576xf32>
    %51 = tpu.matmul %50, %49, %cst_41 {dimension_numbers = #tpu.dot_dimension_numbers<[1], [0], [0], [1], [0, 0, 1, 1], [], []>} : vector<8x24xf32>, vector<24x576xf32>, vector<8x576xf32> -> vector<8x576xf32>
    %c0_42 = arith.constant 0 : index
    %c0_43 = arith.constant 0 : index
    %52 = vector.load %arg5[%c0_42, %c0_43] : memref<8x1xf32, #tpu.memory_space<vmem>>, vector<8x1xf32>
    %53 = vector.broadcast %52 : vector<8x1xf32> to vector<8x576xf32>
    %54 = arith.addf %51, %53 : vector<8x576xf32>
    %55 = vector.extract_strided_slice %54 {offsets = [0, 0], sizes = [8, 288], strides = [1, 1]} : vector<8x576xf32> to vector<8x288xf32>
    %c0_44 = arith.constant 0 : index
    %c0_45 = arith.constant 0 : index
    %c0_46 = arith.constant 0 : index
    %56 = vector.load %arg6[%c0_44, %c0_45, %c0_46] : memref<2x8x288xf32, #tpu.memory_space<vmem>>, vector<1x8x288xf32>
    %57 = vector.shape_cast %56 : vector<1x8x288xf32> to vector<8x288xf32>
    %58 = vector.shape_cast %55 : vector<8x288xf32> to vector<1x8x288xf32>
    tpu.vector_store %arg6[%c0_44, %c0_45, %c0_46], %58 {strides = array<i32>} : memref<2x8x288xf32, #tpu.memory_space<vmem>>, vector<1x8x288xf32>,
    %59 = vector.extract_strided_slice %54 {offsets = [0, 288], sizes = [8, 288], strides = [1, 1]} : vector<8x576xf32> to vector<8x288xf32>
    %c1_47 = arith.constant 1 : index
    %c0_48 = arith.constant 0 : index
    %c0_49 = arith.constant 0 : index
    %60 = vector.load %arg6[%c1_47, %c0_48, %c0_49] : memref<2x8x288xf32, #tpu.memory_space<vmem>>, vector<1x8x288xf32>
    %61 = vector.shape_cast %60 : vector<1x8x288xf32> to vector<8x288xf32>
    %62 = vector.shape_cast %59 : vector<8x288xf32> to vector<1x8x288xf32>
    tpu.vector_store %arg6[%c1_47, %c0_48, %c0_49], %62 {strides = array<i32>} : memref<2x8x288xf32, #tpu.memory_space<vmem>>, vector<1x8x288xf32>,
    return
  }
  func.func @transform_0(%arg0: i32) -> (i32, i32, i32) {
    %c0_i32 = arith.constant 0 : i32
    %c0_i32_0 = arith.constant 0 : i32
    %c0_i32_1 = arith.constant 0 : i32
    return %arg0, %c0_i32, %c0_i32_0 : i32, i32, i32
  }
  func.func @transform_1(%arg0: i32) -> (i32, i32) {
    %c0_i32 = arith.constant 0 : i32
    %c0_i32_0 = arith.constant 0 : i32
    %c0_i32_1 = arith.constant 0 : i32
    return %c0_i32, %c0_i32_0 : i32, i32
  }
  func.func @transform_2(%arg0: i32) -> (i32, i32) {
    %c0_i32 = arith.constant 0 : i32
    %c0_i32_0 = arith.constant 0 : i32
    %c0_i32_1 = arith.constant 0 : i32
    return %c0_i32, %c0_i32_0 : i32, i32
  }
  func.func @transform_3(%arg0: i32) -> (i32, i32) {
    %c0_i32 = arith.constant 0 : i32
    %c0_i32_0 = arith.constant 0 : i32
    %c0_i32_1 = arith.constant 0 : i32
    return %c0_i32, %c0_i32_0 : i32, i32
  }
  func.func @transform_4(%arg0: i32) -> (i32, i32) {
    %c0_i32 = arith.constant 0 : i32
    %c0_i32_0 = arith.constant 0 : i32
    %c0_i32_1 = arith.constant 0 : i32
    return %c0_i32, %c0_i32_0 : i32, i32
  }
  func.func @transform_5(%arg0: i32) -> (i32, i32, i32) {
    %c0_i32 = arith.constant 0 : i32
    %c0_i32_0 = arith.constant 0 : i32
    %c0_i32_1 = arith.constant 0 : i32
    return %arg0, %c0_i32, %c0_i32_0 : i32, i32, i32
  }
}

</mosaic_0001>

<bundles_post_ra>
// kernel: tpu_custom_call.1
= control target key start
LH: loop header
LB: loop body
LE: loop exit
PB: predicated region body
PF: predicated region fallthrough
CT: control target
= control target key end

     0   :  { %10 = vsyncpa [#allocation4], 0  ;;  %s1268_s0 = inlined_call_operand.vmem [shape: f32[2,4,326], index: 0, kind: input, shape index: {}]   ;;  %s1269_s1 = inlined_call_operand.hbm [shape: f32[24,36], index: 1, kind: input, shape index: {}]   ;;  %s1270_s2 = inlined_call_operand.vmem [shape: f32[24,1], index: 2, kind: input, shape index: {}]   ;;  %s1271_s3 = inlined_call_operand.vmem [shape: f32[8,24], index: 3, kind: input, shape index: {}]   ;;  %s1272_s4 = inlined_call_operand.vmem [shape: f32[8,1], index: 4, kind: input, shape index: {}]   ;;  %s1273_s5 = inlined_call_operand.hbm [shape: f32[2,8,288], index: 5, kind: output, shape index: {}]  }
   0x1   :  { %11 = vsyncpa [#allocation5], 0  ;;  %s1063_s18 = smov [#allocation3]  }
   0x2   :  { %s19_s19 = sshll.u32 %s1063_s18, 4  ;;  %s20_s19 = int_to_ptr.vmem [resolvable:$true] %s19_s19 }
   0x3   :  { %s1027_s20 = scalar_lea.vmem %s20_s19, 384  ;;  %p1032_p1 = scmp.lt.s32.totalorder %s20_s19, %s20_s19 }
   0x4   :  { %p1028_p0 = scmp.ne.s32.totalorder %s20_s19, %s1027_s20  ;;  %p1033_p2 = scmp.lt.s32.totalorder %s1027_s20, %s1027_s20 }
   0x6   :  { %p1034_p3 = por %p1033_p2, %p1032_p1 }
   0x8   :  { %p1035_p4 = pnand %p1034_p3, %p1028_p0 }
   0xa   :  { %1038 = shalt.err (!%p1035_p4)
}
   0xb   :  { %s1064_s21 = smov 128   ;;  %s1065_s22 = smov 8  }
   0xc   :  { %25 = dma.hbm_to_vmem [thread:$0]  %s1269_s1, 384, %s20_s19, [#allocation4], %s1064_s21, %s1064_s21, %s1065_s22  }
   0xd   :  { %1059 = dma.done.wait [#allocation4], 384  }
   0xe   :  { %1060 = vsyncadd [#allocation4], 4294966912  ;;  %v36_v0 = vld [vmem:[%s1268_s0 + $0x8] sm:$0xf]  ;;  %v35_v1 = vld [vmem:[%s1268_s0] sm:$0xff]  ;;  %vm43_vm0 = vcmask 257024  }
   0xf   :  { %s1066_s29 = smov 90   ;;  %41 = vst [vmem:[#allocation2] sm:$0xf] %v35_v1  ;;  %v39_v2 = vcombine.high %v35_v1, %v35_v1  ;;  %44 = vst.msk [vmem:[#allocation2 + $0x10] sm:$0xf] %vm43_vm0, %v36_v0  ;;  %s1067_s1 = smov 92   ;;  %v46_v3 = vcombine.low %v36_v0, %v36_v0  ;;  %v45_v4 = vcombine.low %v35_v1, %v35_v1 }
  0x10   :  { %157 = vrot.lane.b32.xlu0 %v36_v0, %s1066_s29  ;;  %153 = vrot.lane.b32.xlu1 %v35_v1, %s1066_s29  ;;  %s1068_s30 = smov 91   ;;  %s1069_s6 = smov 109   ;;  %v925_v5 = vld [vmem:[%s1268_s0 + $0xc] sm:$0xff]  ;;  %v926_v7 = vld [vmem:[%s1268_s0 + $0x14] sm:$0xf]  ;;  %v1075_v8 = vmov 0.0  }
  0x11   :  { %42 = vst [vmem:[#allocation2 + $0x8] sm:$0xf] %v39_v2  ;;  %s1070_s7 = smov 108   ;;  %s1071_s8 = smov 126   ;;  %v173_v6 = vcombine.high %v925_v5, %v925_v5  ;;  %451 = vmatprep.mubr.f32.mxu0 %v1075_v8  ;;  %534 = vmatprep.mubr.f32.mxu1 %v1075_v8  ;;  %v192_v9 = vcombine.low %v926_v7, %v926_v7  ;;  %v345_v11 = vld [vmem:[%s1270_s2 + $0x10] sm:$0xff]  ;;  %v344_v12 = vld [vmem:[%s1270_s2 + $0x8] sm:$0xff] }
  0x12   :  { %s1072_s9 = smov 110   ;;  %s1073_s12 = smov 122   ;;  %v191_v10 = vcombine.low %v925_v5, %v925_v5  ;;  %v1084_v13 = vmov 0   ;;  %v343_v14 = vld [vmem:[%s1270_s2] sm:$0xff]  ;;  %vm129_vm1 = vcmask 752640   ;;  %vm159_vm2 = vcmask 736256  }
  0x13   :  { %s1074_s15 = smov 127   ;;  %s1076_s16 = smov 124   ;;  %1011 = vset.pattern.permute.xlu1 %v1084_v13  ;;  %1012 = vset.pattern.permute.xlu0 %v1084_v13  ;;  %v664_v15 = vld [vmem:[%s1272_s4] sm:$0xff]  ;;  %vm61_vm3 = vcmask 261124   ;;  %vm144_vm4 = vcmask 744448   ;;  %vm371_vm5 = vcmask 1043456  }
  0x14   :  { %127 = vrot.lane.b32.xlu0 %v36_v0, %s1067_s1  ;;  %140 = vrot.lane.b32.xlu1 %v35_v1, %s1068_s30  ;;  %s1077_s17 = smov 123   ;;  %s1078_s0 = smov 13   ;;  %vm99_vm6 = vcmask 891904   ;;  %vm114_vm7 = vcmask 883712   ;;  %vm69_vm8 = vcmask 1031168   ;;  %vm84_vm9 = vcmask 900096  }
  0x15   :  { %s1079_s18 = smov 12   ;;  %s1080_s19 = smov 30   ;;  %vm189_vm10 = vcmask 519168   ;;  %vm306_vm11 = vcmask 998400   ;;  %vm53_vm12 = vcmask 1039360   ;;  %vm186_vm13 = vcmask 1043712  }
  0x16   :  { %s1081_s20 = smov 14   ;;  %s1082_s21 = smov 32   ;;  %vm276_vm14 = vcmask 1014784   ;;  %vm208_vm15 = vcmask 523268  }
  0x17   :  { %s1083_s22 = smov 31  }
  0x18   :  { %125 = vrot.lane.b32.xlu1 %v39_v2, %s1067_s1  ;;  %155 = vrot.lane.b32.xlu0 %v39_v2, %s1066_s29 }
  0x1c   :  { %123 = vrot.lane.b32.xlu1 %v35_v1, %s1067_s1  ;;  %142 = vrot.lane.b32.xlu0 %v46_v3, %s1068_s30 }
  0x20   :  { %95 = vrot.lane.b32.xlu1 %v39_v2, %s1069_s6  ;;  %138 = vrot.lane.b32.xlu0 %v45_v4, %s1068_s30  ;;  %s1087_s30 = smov [#allocation6]  }
  0x24   :  { %110 = vrot.lane.b32.xlu1 %v35_v1, %s1070_s7  ;;  %97 = vrot.lane.b32.xlu0 %v36_v0, %s1069_s6 }
  0x28   :  { %93 = vrot.lane.b32.xlu1 %v35_v1, %s1069_s6  ;;  %112 = vrot.lane.b32.xlu0 %v46_v3, %s1070_s7  ;;  %s913_s6 = sshll.u32 %s1087_s30, 4  ;;  %s914_s6 = int_to_ptr.vmem [resolvable:$true] %s913_s6 }
  0x29   :  { %p1044_p6 = scmp.lt.s32.totalorder %s914_s6, %s914_s6 }
  0x2c   :  { %65 = vrot.lane.b32.xlu1 %v39_v2, %s1071_s8  ;;  %108 = vrot.lane.b32.xlu0 %v45_v4, %s1070_s7  ;;  %s1039_s7 = scalar_lea.vmem %s914_s6, 768 }
  0x2d   :  { %p1040_p5 = scmp.ne.s32.totalorder %s914_s6, %s1039_s7  ;;  %p1045_p7 = scmp.lt.s32.totalorder %s1039_s7, %s1039_s7 }
  0x2f   :  { %p1046_p8 = por %p1045_p7, %p1044_p6 }
  0x30   :  { %80 = vrot.lane.b32.xlu1 %v35_v1, %s1072_s9  ;;  %67 = vrot.lane.b32.xlu0 %v36_v0, %s1071_s8 }
  0x31   :  { %p1047_p9 = pnand %p1046_p8, %p1040_p5 }
  0x34   :  { %63 = vrot.lane.b32.xlu1 %v35_v1, %s1071_s8  ;;  %82 = vrot.lane.b32.xlu0 %v46_v3, %s1072_s9 }
  0x38   :  { %302 = vrot.lane.b32.xlu1 %v173_v6, %s1073_s12  ;;  %78 = vrot.lane.b32.xlu0 %v45_v4, %s1072_s9 }
  0x3c   :  { %49 = vrot.lane.b32.xlu1 %v35_v1, %s1074_s15  ;;  %304 = vrot.lane.b32.xlu0 %v926_v7, %s1073_s12 }
  0x40   :  { %300 = vrot.lane.b32.xlu1 %v925_v5, %s1073_s12  ;;  %51 = vrot.lane.b32.xlu0 %v46_v3, %s1074_s15 }
  0x44   :  { %272 = vrot.lane.b32.xlu1 %v173_v6, %s1076_s16  ;;  %47 = vrot.lane.b32.xlu0 %v45_v4, %s1074_s15 }
  0x48   :  { %287 = vrot.lane.b32.xlu1 %v925_v5, %s1077_s17  ;;  %274 = vrot.lane.b32.xlu0 %v926_v7, %s1076_s16 }
  0x4c   :  { %270 = vrot.lane.b32.xlu1 %v925_v5, %s1076_s16  ;;  %289 = vrot.lane.b32.xlu0 %v192_v9, %s1077_s17 }
  0x50   :  { %240 = vrot.lane.b32.xlu1 %v925_v5, %s1078_s0  ;;  %285 = vrot.lane.b32.xlu0 %v191_v10, %s1077_s17 }
  0x54   :  { %255 = vrot.lane.b32.xlu1 %v191_v10, %s1079_s18  ;;  %242 = vrot.lane.b32.xlu0 %v173_v6, %s1078_s0 }
  0x58   :  { %210 = vrot.lane.b32.xlu1 %v925_v5, %s1080_s19  ;;  %257 = vrot.lane.b32.xlu0 %v925_v5, %s1079_s18 }
  0x5c   :  { %225 = vrot.lane.b32.xlu1 %v191_v10, %s1081_s20  ;;  %212 = vrot.lane.b32.xlu0 %v173_v6, %s1080_s19 }
  0x60   :  { %174 = vrot.lane.b32.xlu1 %v925_v5, %s1082_s21  ;;  %227 = vrot.lane.b32.xlu0 %v925_v5, %s1081_s20 }
  0x64   :  { %193 = vrot.lane.b32.xlu1 %v191_v10, %s1083_s22  ;;  %176 = vrot.lane.b32.xlu0 %v173_v6, %s1082_s21 }
  0x68   :  { %244 = vrot.lane.b32.xlu1 %v926_v7, %s1078_s0  ;;  %195 = vrot.lane.b32.xlu0 %v925_v5, %s1083_s22 }
  0x6c   :  { %214 = vrot.lane.b32.xlu1 %v926_v7, %s1080_s19  ;;  %259 = vrot.lane.b32.xlu0 %v192_v9, %s1079_s18 }
  0x70   :  { %178 = vrot.lane.b32.xlu1 %v926_v7, %s1082_s21  ;;  %229 = vrot.lane.b32.xlu0 %v192_v9, %s1081_s20 }
  0x74   :  { %197 = vrot.lane.b32.xlu0 %v192_v9, %s1083_s22  ;;  %358 = vperm.xlu1 %1011, %v345_v11  }
  0x78   :  { %353 = vperm.xlu0 %1012, %v344_v12   ;;  %348 = vperm.xlu1 %1011, %v343_v14  }
  0x7c   :  { %667 = vperm.xlu1 %1011, %v664_v15   ;;  %v1166_v15 = vld [vmem:[#allocation3] sm:$0xff] }
  0x82   :  { %v158_v16 = vpop.permute.xlu0 %157  ;;  %v154_v17 = vpop.permute.xlu1 %153 }
  0x83   :  { %167 = vst.msk [vmem:[#allocation2 + $0xb0] sm:$0xf] %vm43_vm0, %v158_v16 }
  0x86   :  { %v128_v18 = vpop.permute.xlu0 %127  ;;  %v141_v19 = vpop.permute.xlu1 %140 }
  0x87   :  { %137 = vst.msk [vmem:[#allocation2 + $0x88] sm:$0xf] %vm43_vm0, %v128_v18 }
  0x8a   :  { %v126_v20 = vpop.permute.xlu1 %125  ;;  %v156_v21 = vpop.permute.xlu0 %155 }
  0x8b   :  { %v131_v22 = vsel %vm129_vm1, %v126_v20, %v128_v18  ;;  %v160_v23 = vsel %vm159_vm2, %v154_v17, %v156_v21  ;;  %v161_v24 = vsel %vm159_vm2, %v156_v21, %v158_v16  ;;  %vm205_vm2 = vcmask 1047812  }
  0x8c   :  { %136 = vst [vmem:[#allocation2 + $0x80] sm:$0xf] %v131_v22  ;;  %165 = vst [vmem:[#allocation2 + $0xa0] sm:$0xf] %v160_v23  ;;  %v1177_v22 = vld [vmem:[#allocation3 + $0x8] sm:$0xff] }
  0x8d   :  { %166 = vst [vmem:[#allocation2 + $0xa8] sm:$0xf] %v161_v24 }
  0x8e   :  { %v124_v25 = vpop.permute.xlu1 %123  ;;  %v143_v26 = vpop.permute.xlu0 %142 }
  0x8f   :  { %v130_v27 = vsel %vm129_vm1, %v124_v25, %v126_v20  ;;  %v146_v28 = vsel %vm144_vm4, %v141_v19, %v143_v26  ;;  %152 = vst.msk [vmem:[#allocation2 + $0x88] sm:$0xf0] %vm61_vm3, %v143_v26  ;;  %vm361_vm1 = vcmask 293888  }
  0x90   :  { %135 = vst [vmem:[#allocation2 + $0x78] sm:$0xf] %v130_v27  ;;  %151 = vst [vmem:[#allocation2 + $0x80] sm:$0xf0] %v146_v28  ;;  %v1186_v27 = vld [vmem:[#allocation3 + $0x10] sm:$0xff] }
  0x92   :  { %v96_v29 = vpop.permute.xlu1 %95  ;;  %v139_v30 = vpop.permute.xlu0 %138 }
  0x93   :  { %v145_v31 = vsel %vm144_vm4, %v139_v30, %v141_v19  ;;  %v338_v33 = vld [vmem:[#allocation2 + $0xa0] sm:$0xf]  ;;  %vm261_vm4 = vcmask 97280  }
  0x94   :  { %v339_v32 = vld [vmem:[#allocation2 + $0xa8] sm:$0xf]  ;;  %150 = vst [vmem:[#allocation2 + $0x78] sm:$0xf0] %v145_v31 }
  0x95   :  { %927 = vmatprep.subr.msk.mxu0 %vm371_vm5, %v339_v32 }
  0x96   :  { %928 = vmatpush1.msk.msra.mxu0 %vm371_vm5, %v338_v33  ;;  %v111_v34 = vpop.permute.xlu1 %110  ;;  %v98_v35 = vpop.permute.xlu0 %97 }
  0x97   :  { %v101_v36 = vsel %vm99_vm6, %v96_v29, %v98_v35  ;;  %107 = vst.msk [vmem:[#allocation2 + $0x60] sm:$0xf] %vm43_vm0, %v98_v35  ;;  %v334_v37 = vld [vmem:[#allocation2 + $0x80] sm:$0xff] }
  0x98   :  { %106 = vst [vmem:[#allocation2 + $0x58] sm:$0xf] %v101_v36  ;;  %411 = vmatprep.subr.mxu0 %v334_v37 }
  0x9a   :  { %v94_v38 = vpop.permute.xlu1 %93  ;;  %v113_v39 = vpop.permute.xlu0 %112 }
  0x9b   :  { %v100_v40 = vsel %vm99_vm6, %v94_v38, %v96_v29  ;;  %v116_v41 = vsel %vm114_vm7, %v111_v34, %v113_v39  ;;  %122 = vst.msk [vmem:[#allocation2 + $0x60] sm:$0xf0] %vm61_vm3, %v113_v39  ;;  %v333_v42 = vld [vmem:[#allocation2 + $0x78] sm:$0xff]  ;;  %vm216_vm6 = vcmask 244736  }
  0x9c   :  { %105 = vst [vmem:[#allocation2 + $0x50] sm:$0xf] %v100_v40  ;;  %121 = vst [vmem:[#allocation2 + $0x58] sm:$0xf0] %v116_v41  ;;  %412 = vmatpush1.msra.mxu0 %v333_v42 }
  0x9e   :  { %v66_v43 = vpop.permute.xlu1 %65  ;;  %v109_v44 = vpop.permute.xlu0 %108 }
  0x9f   :  { %v115_v45 = vsel %vm114_vm7, %v109_v44, %v111_v34  ;;  %vm231_vm7 = vcmask 113664  }
  0xa0   :  { %120 = vst [vmem:[#allocation2 + $0x50] sm:$0xf0] %v115_v45 }
  0xa2   :  { %v81_v46 = vpop.permute.xlu1 %80  ;;  %v68_v47 = vpop.permute.xlu0 %67 }
  0xa3   :  { %v71_v48 = vsel %vm69_vm8, %v66_v43, %v68_v47  ;;  %77 = vst.msk [vmem:[#allocation2 + $0x38] sm:$0xf] %vm43_vm0, %v68_v47  ;;  %v329_v49 = vld [vmem:[#allocation2 + $0x58] sm:$0xff]  ;;  %vm291_vm0 = vcmask 1006592  }
  0xa4   :  { %76 = vst [vmem:[#allocation2 + $0x30] sm:$0xf] %v71_v48  ;;  %413 = vmatprep.subr.mxu0 %v329_v49 }
  0xa6   :  { %v64_v50 = vpop.permute.xlu1 %63  ;;  %v83_v51 = vpop.permute.xlu0 %82 }
  0xa7   :  { %v70_v52 = vsel %vm69_vm8, %v64_v50, %v66_v43  ;;  %v86_v53 = vsel %vm84_vm9, %v81_v46, %v83_v51  ;;  %92 = vst.msk [vmem:[#allocation2 + $0x38] sm:$0xf0] %vm61_vm3, %v83_v51  ;;  %v328_v54 = vld [vmem:[#allocation2 + $0x50] sm:$0xff]  ;;  %vm180_vm8 = vcmask 261120  }
  0xa8   :  { %75 = vst [vmem:[#allocation2 + $0x28] sm:$0xf] %v70_v52  ;;  %91 = vst [vmem:[#allocation2 + $0x30] sm:$0xf0] %v86_v53  ;;  %414 = vmatpush1.msra.mxu0 %v328_v54 }
  0xaa   :  { %v303_v55 = vpop.permute.xlu1 %302  ;;  %v79_v56 = vpop.permute.xlu0 %78 }
  0xab   :  { %v85_v57 = vsel %vm84_vm9, %v79_v56, %v81_v46  ;;  %vm199_vm9 = vcmask 252928  }
  0xac   :  { %90 = vst [vmem:[#allocation2 + $0x28] sm:$0xf0] %v85_v57 }
  0xae   :  { %v50_v58 = vpop.permute.xlu1 %49  ;;  %v305_v59 = vpop.permute.xlu0 %304 }
  0xaf   :  { %v308_v60 = vsel %vm306_vm11, %v303_v55, %v305_v59  ;;  %314 = vst.msk [vmem:[#allocation2 + $0xc0] sm:$0xf] %vm189_vm10, %v305_v59  ;;  %v324_v61 = vld [vmem:[#allocation2 + $0x30] sm:$0xff] }
  0xb0   :  { %313 = vst [vmem:[#allocation2 + $0xb8] sm:$0xf] %v308_v60  ;;  %415 = vmatprep.subr.mxu0 %v324_v61 }
  0xb2   :  { %v301_v62 = vpop.permute.xlu1 %300  ;;  %v52_v63 = vpop.permute.xlu0 %51 }
  0xb3   :  { %v307_v0 = vsel %vm306_vm11, %v301_v62, %v303_v55  ;;  %v55_v1 = vsel %vm53_vm12, %v50_v58, %v52_v63  ;;  %62 = vst.msk [vmem:[#allocation2 + $0x10] sm:$0xf0] %vm61_vm3, %v52_v63  ;;  %v323_v2 = vld [vmem:[#allocation2 + $0x28] sm:$0xff]  ;;  %vm246_vm3 = vcmask 105472   ;;  %vm898_vm11 = vcmask 785408  }
  0xb4   :  { %312 = vst.msk [vmem:[#allocation2 + $0xb0] sm:$0xf] %vm186_vm13, %v307_v0  ;;  %60 = vst [vmem:[#allocation2 + $0x8] sm:$0xf0] %v55_v1  ;;  %416 = vmatpush1.msra.mxu0 %v323_v2 }
  0xb6   :  { %v273_v3 = vpop.permute.xlu1 %272  ;;  %v48_v4 = vpop.permute.xlu0 %47  ;;  %v342_v19 = vld [vmem:[#allocation2 + $0xc0] sm:$0xf] }
  0xb7   :  { %v54_v5 = vsel %vm53_vm12, %v48_v4, %v50_v58  ;;  %v341_v6 = vld [vmem:[#allocation2 + $0xb8] sm:$0xf] }
  0xb8   :  { %59 = vst [vmem:[#allocation2] sm:$0xf0] %v54_v5  ;;  %932 = vmatprep.subr.msk.mxu1 %vm371_vm5, %v341_v6 }
  0xba   :  { %v288_v7 = vpop.permute.xlu1 %287  ;;  %v275_v9 = vpop.permute.xlu0 %274 }
  0xbb   :  { %v278_v10 = vsel %vm276_vm14, %v273_v3, %v275_v9  ;;  %284 = vst.msk [vmem:[#allocation2 + $0x98] sm:$0xf] %vm189_vm10, %v275_v9  ;;  %v319_v11 = vld [vmem:[#allocation2 + $0x8] sm:$0xff]  ;;  %v340_v12 = vld [vmem:[#allocation2 + $0xb0] sm:$0xf] }
  0xbc   :  { %283 = vst [vmem:[#allocation2 + $0x90] sm:$0xf] %v278_v10  ;;  %417 = vmatprep.subr.mxu0 %v319_v11  ;;  %933 = vmatpush1.msk.msra.mxu1 %vm371_vm5, %v340_v12 }
  0xbe   :  { %v271_v13 = vpop.permute.xlu1 %270  ;;  %v290_v14 = vpop.permute.xlu0 %289 }
  0xbf   :  { %v277_v16 = vsel %vm276_vm14, %v271_v13, %v273_v3  ;;  %v293_v17 = vsel %vm291_vm0, %v288_v7, %v290_v14  ;;  %299 = vst.msk [vmem:[#allocation2 + $0x98] sm:$0xf0] %vm208_vm15, %v290_v14  ;;  %v318_v18 = vld [vmem:[#allocation2] sm:$0xff] }
  0xc0   :  { %282 = vst.msk [vmem:[#allocation2 + $0x88] sm:$0xf] %vm186_vm13, %v277_v16  ;;  %298 = vst [vmem:[#allocation2 + $0x90] sm:$0xf0] %v293_v17  ;;  %418 = vmatpush1.msra.mxu0 %v318_v18 }
  0xc1   :  { %929 = vmatmul.mubr.msk.f32.vlgmr.msra.gmra.mxu0 %vm361_vm1, %v1166_v15  ;;  %956 = vmatprep.subr.mxu0 %v1075_v8 }
  0xc2   :  { %v241_v20 = vpop.permute.xlu1 %240  ;;  %v286_v21 = vpop.permute.xlu0 %285  ;;  %957 = vmatpush3.msk.msra.mxu0 %vm371_vm5, %v342_v19  ;;  %457 = vmatprep.mubr.f32.mxu0 %v1075_v8  ;;  %vm1085_vm5 = vmmov 0  }
  0xc3   :  { %252 = vst.msk [vmem:[#allocation2 + $0x60] sm:$0xf] %vm186_vm13, %v241_v20  ;;  %v292_v23 = vsel %vm291_vm0, %v286_v21, %v288_v7  ;;  %958 = vmatprep.subr.mxu0 %v1075_v8 }
  0xc4   :  { %297 = vst.msk [vmem:[#allocation2 + $0x88] sm:$0xf0] %vm205_vm2, %v292_v23 }
  0xc5   :  { %930 = vmatmul.mubr.msk.f32.gmra.mxu0 %vm361_vm1, %v1177_v22 }
  0xc6   :  { %v256_v24 = vpop.permute.xlu1 %255  ;;  %v243_v25 = vpop.permute.xlu0 %242  ;;  %v337_v26 = vld [vmem:[#allocation2 + $0x98] sm:$0xff]  ;;  %463 = vmatprep.mubr.f32.mxu0 %v1075_v8 }
  0xc7   :  { %267 = vst.msk [vmem:[#allocation2 + $0x60] sm:$0xf0] %vm205_vm2, %v256_v24  ;;  %v247_v28 = vsel %vm246_vm3, %v241_v20, %v243_v25  ;;  %959 = vmatpush3.msra.mxu0 %v337_v26  ;;  %v336_v29 = vld [vmem:[#allocation2 + $0x90] sm:$0xff] }
  0xc8   :  { %253 = vst [vmem:[#allocation2 + $0x68] sm:$0xf] %v247_v28  ;;  %494 = vmatprep.subr.mxu1 %v336_v29  ;;  %960 = vmatprep.subr.mxu0 %v1075_v8 }
  0xc9   :  { %931 = vmatmul.mubr.msk.f32.gmra.mxu0 %vm361_vm1, %v1186_v27 }
  0xca   :  { %v211_v30 = vpop.permute.xlu1 %210  ;;  %v258_v31 = vpop.permute.xlu0 %257  ;;  %966 = vmatprep.mubr.msk.f32.mxu0 %vm1085_vm5, %v1075_v8 }
  0xcb   :  { %222 = vst.msk [vmem:[#allocation2 + $0x38] sm:$0xf] %vm186_vm13, %v211_v30  ;;  %v262_v32 = vsel %vm261_vm4, %v256_v24, %v258_v31  ;;  %v335_v33 = vld [vmem:[#allocation2 + $0x88] sm:$0xff] }
  0xcc   :  { %268 = vst [vmem:[#allocation2 + $0x68] sm:$0xf0] %v262_v32  ;;  %495 = vmatpush1.msra.mxu1 %v335_v33 }
  0xce   :  { %v226_v34 = vpop.permute.xlu1 %225  ;;  %v213_v35 = vpop.permute.xlu0 %212  ;;  %v330_v41 = vld [vmem:[#allocation2 + $0x60] sm:$0xff] }
  0xcf   :  { %237 = vst.msk [vmem:[#allocation2 + $0x38] sm:$0xf0] %vm205_vm2, %v226_v34  ;;  %v217_v36 = vsel %vm216_vm6, %v211_v30, %v213_v35  ;;  %v663_v30 = vld [vmem:[%s1271_s3] sm:$0xff]  ;;  %s1086_s3 = smov 96  }
  0xd0   :  { %223 = vst [vmem:[#allocation2 + $0x40] sm:$0xf] %v217_v36 }
  0xd2   :  { %v175_v37 = vpop.permute.xlu1 %174  ;;  %v228_v38 = vpop.permute.xlu0 %227 }
  0xd3   :  { %187 = vst.msk [vmem:[#allocation2 + $0x10] sm:$0xf] %vm186_vm13, %v175_v37  ;;  %v232_v39 = vsel %vm231_vm7, %v226_v34, %v228_v38  ;;  %v331_v40 = vld [vmem:[#allocation2 + $0x68] sm:$0xff] }
  0xd4   :  { %238 = vst [vmem:[#allocation2 + $0x40] sm:$0xf0] %v232_v39  ;;  %496 = vmatprep.subr.mxu1 %v331_v40 }
  0xd5   :  { %497 = vmatpush1.msra.mxu1 %v330_v41 }
  0xd6   :  { %v194_v42 = vpop.permute.xlu1 %193  ;;  %v177_v43 = vpop.permute.xlu0 %176  ;;  %v325_v50 = vld [vmem:[#allocation2 + $0x38] sm:$0xff] }
  0xd7   :  { %206 = vst.msk [vmem:[#allocation2 + $0x10] sm:$0xf0] %vm205_vm2, %v194_v42  ;;  %v181_v44 = vsel %vm180_vm8, %v175_v37, %v177_v43 }
  0xd8   :  { %188 = vst [vmem:[#allocation2 + $0x18] sm:$0xf] %v181_v44 }
  0xda   :  { %v245_v45 = vpop.permute.xlu1 %244  ;;  %v196_v46 = vpop.permute.xlu0 %195 }
  0xdb   :  { %v248_v47 = vsel %vm246_vm3, %v243_v25, %v245_v45  ;;  %v200_v48 = vsel %vm199_vm9, %v194_v42, %v196_v46  ;;  %v326_v49 = vld [vmem:[#allocation2 + $0x40] sm:$0xff] }
  0xdc   :  { %254 = vst.msk [vmem:[#allocation2 + $0x70] sm:$0xf] %vm189_vm10, %v248_v47  ;;  %207 = vst [vmem:[#allocation2 + $0x18] sm:$0xf0] %v200_v48  ;;  %498 = vmatprep.subr.mxu1 %v326_v49 }
  0xdd   :  { %499 = vmatpush1.msra.mxu1 %v325_v50 }
  0xde   :  { %v215_v51 = vpop.permute.xlu1 %214  ;;  %v260_v52 = vpop.permute.xlu0 %259  ;;  %v320_v60 = vld [vmem:[#allocation2 + $0x10] sm:$0xff] }
  0xdf   :  { %v218_v53 = vsel %vm216_vm6, %v213_v35, %v215_v51  ;;  %v263_v54 = vsel %vm261_vm4, %v258_v31, %v260_v52 }
  0xe0   :  { %224 = vst.msk [vmem:[#allocation2 + $0x48] sm:$0xf] %vm189_vm10, %v218_v53 }
  0xe1   :  { %269 = vst.msk [vmem:[#allocation2 + $0x70] sm:$0xf0] %vm208_vm15, %v263_v54 }
  0xe2   :  { %v179_v55 = vpop.permute.xlu1 %178  ;;  %v230_v56 = vpop.permute.xlu0 %229 }
  0xe3   :  { %v182_v57 = vsel %vm180_vm8, %v177_v43, %v179_v55  ;;  %v233_v58 = vsel %vm231_vm7, %v228_v38, %v230_v56  ;;  %v321_v59 = vld [vmem:[#allocation2 + $0x18] sm:$0xff] }
  0xe4   :  { %190 = vst.msk [vmem:[#allocation2 + $0x20] sm:$0xf] %vm189_vm10, %v182_v57  ;;  %500 = vmatprep.subr.mxu1 %v321_v59  ;;  %vm670_vm10 = vcmask 195584  }
  0xe5   :  { %239 = vst.msk [vmem:[#allocation2 + $0x48] sm:$0xf0] %vm208_vm15, %v233_v58  ;;  %501 = vmatpush1.msra.mxu1 %v320_v60 }
  0xe6   :  { %934 = vmatmul.mubr.msk.f32.vlgmr.msra.gmra.mxu1 %vm361_vm1, %v1166_v15  ;;  %v198_v61 = vpop.permute.xlu0 %197 }
  0xe7   :  { %v201_v62 = vsel %vm199_vm9, %v196_v46, %v198_v61  ;;  %540 = vmatprep.mubr.f32.mxu1 %v1075_v8 }
  0xe8   :  { %v332_v63 = vld [vmem:[#allocation2 + $0x70] sm:$0xff]  ;;  %209 = vst.msk [vmem:[#allocation2 + $0x20] sm:$0xf0] %vm208_vm15, %v201_v62 }
  0xe9   :  { %961 = vmatpush3.msra.mxu0 %v332_v63 }
  0xea   :  { %962 = vmatprep.subr.mxu0 %v1075_v8  ;;  %935 = vmatmul.mubr.msk.f32.gmra.mxu1 %vm361_vm1, %v1177_v22 }
  0xeb   :  { %546 = vmatprep.mubr.f32.mxu1 %v1075_v8 }
  0xec   :  { %v327_v0 = vld [vmem:[#allocation2 + $0x48] sm:$0xff] }
  0xed   :  { %963 = vmatpush3.msra.mxu0 %v327_v0 }
  0xee   :  { %964 = vmatprep.subr.mxu0 %v1075_v8  ;;  %936 = vmatmul.mubr.msk.f32.gmra.mxu1 %vm361_vm1, %v1186_v27 }
  0xef   :  { %v322_v1 = vld [vmem:[#allocation2 + $0x20] sm:$0xff]  ;;  %738 = vmatprep.mubr.f32.mxu1 %v1075_v8  ;;  %v1240_v3 = vpop.permute.xlu1 %358 }
  0xf0   :  { %965 = vmatpush3.msra.mxu0 %v322_v1 }
  0xf1   :  { %967 = vmatmul.mubr.msk.f32.vlgmr.msra.gmra.mxu0 %vm361_vm1, %v1166_v15  ;;  %975 = vmatprep.subr.mxu0 %v1075_v8 }
  0xf2   :  { %969 = vmatprep.mubr.msk.f32.mxu0 %vm1085_vm5, %v1075_v8 }
  0xf3   :  { %v354_v6 = vpop.permute.xlu0 %353  ;;  %v1242_v9 = vpop.permute.xlu1 %348 }
  0xf5   :  { %970 = vmatmul.mubr.msk.f32.gmra.mxu0 %vm361_vm1, %v1177_v22 }
  0xf6   :  { %972 = vmatprep.mubr.msk.f32.mxu0 %vm1085_vm5, %v1075_v8 }
  0xf9   :  { %973 = vmatmul.mubr.msk.f32.gmra.mxu0 %vm361_vm1, %v1186_v27 }
  0xfa   :  { %981 = vmatprep.mubr.msk.f32.mxu0 %vm1085_vm5, %v1075_v8 }
 0x181   :  { %v453_v2 = vpop.f32.mrf.mxu0 }
 0x182   :  { %v454_v16 = vadd.f32 %v453_v2, %v1242_v9 }
 0x183   :  { %v455_v4 = vpop.f32.mrf.mxu0 }
 0x184   :  { %v456_v14 = vadd.f32 %v455_v4, %v1242_v9  ;;  %v633_v24 = vmax.f32 %v454_v16, 0.0 }
 0x185   :  { %v459_v5 = vpop.f32.mrf.mxu0 }
 0x186   :  { %v460_v12 = vadd.f32 %v459_v5, %v354_v6  ;;  %v634_v22 = vmax.f32 %v456_v14, 0.0  ;;  %v648_v29 = vmin.f32 %v633_v24, 6.0 }
 0x187   :  { %v461_v7 = vpop.f32.mrf.mxu0 }
 0x188   :  { %v462_v10 = vadd.f32 %v461_v7, %v354_v6  ;;  %v638_v20 = vmax.f32 %v460_v12, 0.0  ;;  %v649_v28 = vmin.f32 %v634_v22, 6.0 }
 0x189   :  { %v465_v11 = vpop.f32.mrf.mxu0 }
 0x18a   :  { %v466_v13 = vadd.f32 %v465_v11, %v1240_v3  ;;  %v639_v19 = vmax.f32 %v462_v10, 0.0  ;;  %v653_v27 = vmin.f32 %v638_v20, 6.0 }
 0x18b   :  { %v467_v15 = vpop.f32.mrf.mxu0 }
 0x18c   :  { %v468_v17 = vadd.f32 %v467_v15, %v1240_v3  ;;  %v643_v18 = vmax.f32 %v466_v13, 0.0  ;;  %v654_v26 = vmin.f32 %v639_v19, 6.0 }
 0x18e   :  { %v644_v21 = vmax.f32 %v468_v17, 0.0  ;;  %v658_v23 = vmin.f32 %v643_v18, 6.0 }
 0x190   :  { %v659_v25 = vmin.f32 %v644_v21, 6.0 }
 0x192   :  { %700 = vmatprep.subr.mxu1 %v659_v25 }
 0x193   :  { %701 = vmatpush1.msra.mxu1 %v658_v23 }
 0x194   :  { %702 = vmatprep.subr.mxu1 %v654_v26 }
 0x195   :  { %703 = vmatpush1.msra.mxu1 %v653_v27 }
 0x196   :  { %704 = vmatprep.subr.mxu1 %v649_v28 }
 0x197   :  { %705 = vmatpush1.msra.mxu1 %v648_v29 }
 0x198   :  { %941 = vmatmul.mubr.msk.f32.vlgmr.msra.gmra.mxu1 %vm670_vm10, %v663_v30 }
 0x199   :  { %809 = vmatprep.mubr.f32.mxu1 %v1075_v8 }
 0x1a6   :  { %v536_v31 = vpop.f32.mrf.mxu1 }
 0x1a7   :  { %v537_v43 = vadd.f32 %v536_v31, %v1242_v9 }
 0x1a8   :  { %v538_v32 = vpop.f32.mrf.mxu1 }
 0x1a9   :  { %v539_v40 = vadd.f32 %v538_v32, %v1242_v9  ;;  %v635_v52 = vmax.f32 %v537_v43, 0.0 }
 0x1aa   :  { %v542_v33 = vpop.f32.mrf.mxu1 }
 0x1ab   :  { %v543_v38 = vadd.f32 %v542_v33, %v354_v6  ;;  %v636_v49 = vmax.f32 %v539_v40, 0.0  ;;  %v650_v60 = vmin.f32 %v635_v52, 6.0 }
 0x1ac   :  { %v544_v34 = vpop.f32.mrf.mxu1 }
 0x1ad   :  { %v545_v36 = vadd.f32 %v544_v34, %v354_v6  ;;  %v640_v48 = vmax.f32 %v543_v38, 0.0  ;;  %v651_v58 = vmin.f32 %v636_v49, 6.0 }
 0x1ae   :  { %v548_v35 = vpop.f32.mrf.mxu1 }
 0x1af   :  { %v549_v37 = vadd.f32 %v548_v35, %v1240_v3  ;;  %v641_v45 = vmax.f32 %v545_v36, 0.0  ;;  %v655_v56 = vmin.f32 %v640_v48, 6.0 }
 0x1b0   :  { %v550_v39 = vpop.f32.mrf.mxu1 }
 0x1b1   :  { %v551_v41 = vadd.f32 %v550_v39, %v1240_v3  ;;  %v619_v42 = vpop.f32.mrf.mxu0  ;;  %v645_v44 = vmax.f32 %v549_v37, 0.0  ;;  %v656_v54 = vmin.f32 %v641_v45, 6.0 }
 0x1b2   :  { %v620_v61 = vadd.f32 %v619_v42, %v1242_v9 }
 0x1b3   :  { %v646_v46 = vmax.f32 %v551_v41, 0.0  ;;  %v968_v47 = vpop.f32.mrf.mxu0  ;;  %v660_v53 = vmin.f32 %v645_v44, 6.0 }
 0x1b4   :  { %v637_v2 = vmax.f32 %v620_v61, 0.0 }
 0x1b5   :  { %v661_v50 = vmin.f32 %v646_v46, 6.0  ;;  %v624_v51 = vpop.f32.mrf.mxu0 }
 0x1b6   :  { %v625_v57 = vadd.f32 %v624_v51, %v354_v6  ;;  %v652_v6 = vmin.f32 %v637_v2, 6.0 }
 0x1b7   :  { %v971_v55 = vpop.f32.mrf.mxu0  ;;  %771 = vmatprep.subr.mxu1 %v661_v50 }
 0x1b8   :  { %772 = vmatpush1.msra.mxu1 %v660_v53  ;;  %v642_v0 = vmax.f32 %v625_v57, 0.0 }
 0x1b9   :  { %v629_v59 = vpop.f32.mrf.mxu0  ;;  %773 = vmatprep.subr.mxu1 %v656_v54 }
 0x1ba   :  { %v630_v62 = vadd.f32 %v629_v59, %v1240_v3  ;;  %774 = vmatpush1.msra.mxu1 %v655_v56  ;;  %v657_v5 = vmin.f32 %v642_v0, 6.0  ;;  %v668_v3 = vpop.permute.xlu1 %667 }
 0x1bb   :  { %v974_v63 = vpop.f32.mrf.mxu0  ;;  %775 = vmatprep.subr.mxu1 %v651_v58 }
 0x1bc   :  { %v647_v1 = vmax.f32 %v630_v62, 0.0  ;;  %776 = vmatpush1.msra.mxu1 %v650_v60 }
 0x1bd   :  { %942 = vmatmul.mubr.msk.f32.vlgmr.msra.gmra.mxu1 %vm670_vm10, %v663_v30 }
 0x1be   :  { %v662_v4 = vmin.f32 %v647_v1, 6.0 }
 0x1c0   :  { %976 = vmatpush3.msra.mxu0 %v662_v4 }
 0x1c1   :  { %977 = vmatprep.subr.mxu0 %v1075_v8 }
 0x1c2   :  { %978 = vmatpush3.msra.mxu0 %v657_v5 }
 0x1c3   :  { %979 = vmatprep.subr.mxu0 %v1075_v8 }
 0x1c4   :  { %980 = vmatpush3.msra.mxu0 %v652_v6 }
 0x1c5   :  { %982 = vmatmul.mubr.msk.f32.vlgmr.msra.gmra.mxu0 %vm670_vm10, %v663_v30 }
 0x258   :  { %v740_v7 = vpop.f32.mrf.mxu1 }
 0x259   :  { %v741_v9 = vadd.f32 %v740_v7, %v668_v3 }
 0x25a   :  { %v742_v10 = vpop.f32.mrf.mxu1 }
 0x25b   :  { %886 = vst [vmem:[#allocation6] sm:$0xff] %v741_v9  ;;  %v743_v11 = vadd.f32 %v742_v10, %v668_v3 }
 0x25d   :  { %887 = vst [vmem:[#allocation6 + $0x8] sm:$0xff] %v743_v11 }
 0x27d   :  { %v811_v12 = vpop.f32.mrf.mxu1 }
 0x27e   :  { %v812_v13 = vadd.f32 %v811_v12, %v668_v3 }
 0x27f   :  { %v813_v14 = vpop.f32.mrf.mxu1 }
 0x280   :  { %888 = vst.msk [vmem:[#allocation6 + $0x10] sm:$0xff] %vm180_vm8, %v812_v13  ;;  %v814_v15 = vadd.f32 %v813_v14, %v668_v3  ;;  %892 = vrot.lane.b32.xlu0 %v812_v13, %s1086_s3 }
 0x282   :  { %894 = vrot.lane.b32.xlu1 %v814_v15, %s1086_s3 }
 0x285   :  { %v882_v8 = vpop.f32.mrf.mxu0 }
 0x286   :  { %v883_v16 = vadd.f32 %v882_v8, %v668_v3 }
 0x287   :  { %v983_v17 = vpop.f32.mrf.mxu0 }
 0x288   :  { %896 = vrot.lane.b32.xlu0 %v883_v16, %s1086_s3 }
 0x2f2   :  { %v893_v18 = vpop.permute.xlu0 %892 }
 0x2f4   :  { %v895_v19 = vpop.permute.xlu1 %894 }
 0x2f5   :  { %v899_v20 = vsel %vm898_vm11, %v893_v18, %v895_v19 }
 0x2f6   :  { %905 = vst [vmem:[#allocation6 + $0x18] sm:$0xff] %v899_v20 }
 0x2fa   :  { %v897_v21 = vpop.permute.xlu0 %896 }
 0x2fb   :  { %v900_v22 = vsel %vm898_vm11, %v895_v19, %v897_v21  ;;  %907 = vst.msk [vmem:[#allocation6 + $0x28] sm:$0xff] %vm180_vm8, %v897_v21 }
 0x2fc   :  { %906 = vst [vmem:[#allocation6 + $0x20] sm:$0xff] %v900_v22 }
 0x2fd   :  { %1050 = shalt.err (!%p1047_p9)
}
 0x2fe   :  { %s1088_s8 = smov 384   ;;  %s1089_s9 = smov 24  }
 0x2ff   :  { %919 = dma.vmem_to_hbm [thread:$0]  %s914_s6, 768, %s1273_s5, [#allocation5], %s1088_s8, %s1088_s8, %s1089_s9  }
 0x300   :  { %1061 = dma.done.wait [#allocation5], 768  }
 0x301   :  { %1062 = vsyncadd [#allocation5], 4294966528 }
 0x302   :  { %923 = vsyncpa [#allocation4], 1 }
 0x303   :  { %924 = vsyncpa [#allocation5], 1 }

</bundles_post_ra>
